<compile_context>
chip_gen: v7x
topology: tpu7x:2x2x1
jax: 0.10.0
libtpu: 0.0.40
codegen_flags: <defaults>
</compile_context>

<pallas_src>
import functools

import numpy as np
import jax
import jax.numpy as jnp
from jax.experimental import pallas as pl
from jax.experimental.pallas import tpu as pltpu


# ----------------------------------------------------------------------------
# Parameter construction (host-side, identical to the PyTorch module's init).
# ----------------------------------------------------------------------------
def imagenet_svd_sqrt() -> np.ndarray:
    color_correlation_svd_sqrt = np.asarray(
        [[0.26, 0.09, 0.02],
         [0.27, 0.0, -0.05],
         [0.27, -0.09, 0.03]]).astype("float32")
    max_norm_svd_sqrt = np.max(np.linalg.norm(color_correlation_svd_sqrt, axis=0))
    color_correlation_normalized = color_correlation_svd_sqrt / max_norm_svd_sqrt
    return color_correlation_normalized.T  # (3, 3) float32


def get_decomposition(covariance: np.ndarray) -> np.ndarray:
    W = np.linalg.cholesky(np.linalg.inv(covariance))
    return np.linalg.inv(W)


# ----------------------------------------------------------------------------
# Kernel.
# ----------------------------------------------------------------------------
def color_decorr_kernel(x_ref, o_ref, *, m):
    """x_ref / o_ref: (1, C, ROWS, LANES).  `m` is a CxC nested tuple of
    Python floats baked in at trace time."""
    C = x_ref.shape[1]
    # Load each channel plane once; reuse for every output channel.
    planes = [x_ref[0, c, :, :] for c in range(C)]
    for d in range(C):                       # static unroll (C == 3 typically)
        acc = planes[0] * m[0][d]
        for c in range(1, C):
            acc = acc + planes[c] * m[c][d]
        o_ref[0, d, :, :] = acc


# ----------------------------------------------------------------------------
# Wrapper.
# ----------------------------------------------------------------------------
_TARGET_BLOCK_BYTES = 3 * 1024 * 1024  # per input block; ~12 MiB total w/ dbl-buf


def _row_block(rows_total: int, C: int, lanes: int, itemsize: int,
               rows_per_block) -> int:
    """Pick the row-tile size.  Either the full row extent (always a legal
    block) or a multiple of 8 derived from a VMEM byte budget."""
    if rows_per_block is None:
        bytes_per_row = max(1, C * lanes * itemsize)
        target = max(8, (_TARGET_BLOCK_BYTES // bytes_per_row) // 8 * 8)
    else:
        target = max(8, (rows_per_block // 8) * 8)
    if rows_total <= target:
        return rows_total          # full extent: legal regardless of alignment
    return target                  # multiple of 8: legal as a partial tile


def _run(x4: jax.Array, kernel, rows_total: int, lanes: int,
         rows_per_block, vmem_limit_bytes) -> jax.Array:
    N, C = x4.shape[0], x4.shape[1]
    rb = _row_block(rows_total, C, lanes, x4.dtype.itemsize, rows_per_block)
    grid = (N, pl.cdiv(rows_total, rb))
    return pl.pallas_call(
        kernel,
        out_shape=jax.ShapeDtypeStruct((N, C, rows_total, lanes), x4.dtype),
        grid=grid,
        in_specs=[pl.BlockSpec((1, C, rb, lanes), lambda n, t: (n, 0, t, 0))],
        out_specs=pl.BlockSpec((1, C, rb, lanes), lambda n, t: (n, 0, t, 0)),
        compiler_params=pltpu.CompilerParams(
            dimension_semantics=("parallel", "parallel"),
            vmem_limit_bytes=vmem_limit_bytes),
    )(x4)


def color_decorrelation(x: jax.Array, m=None, *, rows_per_block=None,
                        vmem_limit_bytes=None) -> jax.Array:
    """x: (N, C, H, W); m: (C, C) host constant (numpy / nested list) or None
    for the ImageNet default."""
    N, C, H, W = x.shape
    m = imagenet_svd_sqrt() if m is None else np.asarray(m, dtype=np.float32)
    assert m.shape == (C, C)
    m_const = tuple(tuple(float(v) for v in row) for row in m)
    kernel = functools.partial(color_decorr_kernel, m=m_const)

    P = H * W
    if P % 128 == 0:
        # Lane-dense path: flatten the pixel axis into (rows, 128).
        R = P // 128
        x4 = x.reshape(N, C, R, 128)
        out = _run(x4, kernel, R, 128, rows_per_block, vmem_limit_bytes)
        return out.reshape(N, C, H, W)

    # Fallback (H*W not a multiple of 128): keep (H, W) planes, tile over H.
    # Output last dim = W (< or not a multiple of 128) means masked stores,
    # but these odd shapes are rare for this module.
    return _run(x, kernel, H, W, rows_per_block, vmem_limit_bytes)


# ----------------------------------------------------------------------------
# Pure-JAX reference (exact replica of the PyTorch forward).
# ----------------------------------------------------------------------------
def _reference(x: jax.Array, m: np.ndarray) -> jax.Array:
    m_j = jnp.asarray(m, dtype=jnp.float32)
    x_t = jnp.transpose(x, (0, 3, 2, 1))           # (N, W, H, C)
    return jnp.transpose(x_t @ m_j, (0, 3, 2, 1))  # (N, C, H, W)


if __name__ == "__main__":
    m = imagenet_svd_sqrt()  # deterministic (3, 3) buffer
    C = 3

    def check(x, **kw):
        out = jax.block_until_ready(color_decorrelation(x, m, **kw))
        assert out.shape == x.shape and out.dtype == x.dtype
        np.testing.assert_allclose(np.asarray(out), np.asarray(_reference(x, m)),
                                   rtol=1e-6, atol=1e-6)

    key = jax.random.PRNGKey(0)

    # 1) Small NCHW input (single pixel tile per image), lane-dense path.
    x = jax.random.normal(key, (2, C, 16, 16), dtype=jnp.float32)
    check(x)

    # 2) Multi-tile grid over the flattened pixel axis (evenly divisible).
    x2 = jax.random.normal(key, (2, C, 64, 64), dtype=jnp.float32)
    check(x2, rows_per_block=8)

    # 3) Non-divisible pixel tiling (masked boundary block on the row axis).
    x3 = jax.random.normal(key, (2, C, 40, 128), dtype=jnp.float32)
    check(x3, rows_per_block=16)

    # 4) Fallback path: H*W not a multiple of 128, tiled over H with an edge.
    x4 = jax.random.normal(key, (2, C, 48, 20), dtype=jnp.float32)
    check(x4, rows_per_block=16)

    print("KERNEL_OK")
</pallas_src>

<mosaic_0001>
module attributes {stable_mosaic.version = 11 : i64} {
  func.func @color_decorr_kernel(%arg0: i32, %arg1: i32, %arg2: memref<1x3x2x128xf32, #tpu.memory_space<vmem>>, %arg3: memref<1x3x2x128xf32, #tpu.memory_space<vmem>>) attributes {dimension_semantics = [#tpu.dimension_semantics<parallel>, #tpu.dimension_semantics<parallel>], iteration_bounds = array<i64: 2, 1>, scalar_prefetch = 0 : i64, scratch_operands = 0 : i64, tpu.core_type = #tpu.core_type<tc>, window_params = [{transform_indices = @transform_0, window_bounds = array<i64: 1, 3, 2, 128>}, {transform_indices = @transform_1, window_bounds = array<i64: 1, 3, 2, 128>}]} {
    %c0 = arith.constant 0 : index
    %c0_0 = arith.constant 0 : index
    %c0_1 = arith.constant 0 : index
    %c0_2 = arith.constant 0 : index
    %0 = vector.load %arg2[%c0, %c0_0, %c0_1, %c0_2] : memref<1x3x2x128xf32, #tpu.memory_space<vmem>>, vector<1x1x2x128xf32>
    %1 = vector.shape_cast %0 : vector<1x1x2x128xf32> to vector<2x128xf32>
    %c0_3 = arith.constant 0 : index
    %c1 = arith.constant 1 : index
    %c0_4 = arith.constant 0 : index
    %c0_5 = arith.constant 0 : index
    %2 = vector.load %arg2[%c0_3, %c1, %c0_4, %c0_5] : memref<1x3x2x128xf32, #tpu.memory_space<vmem>>, vector<1x1x2x128xf32>
    %3 = vector.shape_cast %2 : vector<1x1x2x128xf32> to vector<2x128xf32>
    %c0_6 = arith.constant 0 : index
    %c2 = arith.constant 2 : index
    %c0_7 = arith.constant 0 : index
    %c0_8 = arith.constant 0 : index
    %4 = vector.load %arg2[%c0_6, %c2, %c0_7, %c0_8] : memref<1x3x2x128xf32, #tpu.memory_space<vmem>>, vector<1x1x2x128xf32>
    %5 = vector.shape_cast %4 : vector<1x1x2x128xf32> to vector<2x128xf32>
    %cst = arith.constant 0.562828541 : f32
    %6 = vector.broadcast %cst : f32 to vector<2x128xf32>
    %7 = arith.mulf %1, %6 : vector<2x128xf32>
    %cst_9 = arith.constant 0.194825277 : f32
    %8 = vector.broadcast %cst_9 : f32 to vector<2x128xf32>
    %9 = arith.mulf %3, %8 : vector<2x128xf32>
    %10 = arith.addf %7, %9 : vector<2x128xf32>
    %cst_10 = arith.constant 0.0432945043 : f32
    %11 = vector.broadcast %cst_10 : f32 to vector<2x128xf32>
    %12 = arith.mulf %5, %11 : vector<2x128xf32>
    %13 = arith.addf %10, %12 : vector<2x128xf32>
    %c0_11 = arith.constant 0 : index
    %c0_12 = arith.constant 0 : index
    %c0_13 = arith.constant 0 : index
    %c0_14 = arith.constant 0 : index
    %14 = vector.load %arg3[%c0_11, %c0_12, %c0_13, %c0_14] : memref<1x3x2x128xf32, #tpu.memory_space<vmem>>, vector<1x1x2x128xf32>
    %15 = vector.shape_cast %14 : vector<1x1x2x128xf32> to vector<2x128xf32>
    %16 = vector.shape_cast %13 : vector<2x128xf32> to vector<1x1x2x128xf32>
    tpu.vector_store %arg3[%c0_11, %c0_12, %c0_13, %c0_14], %16 {strides = array<i32>} : memref<1x3x2x128xf32, #tpu.memory_space<vmem>>, vector<1x1x2x128xf32>,
    %cst_15 = arith.constant 0.584475815 : f32
    %17 = vector.broadcast %cst_15 : f32 to vector<2x128xf32>
    %18 = arith.mulf %1, %17 : vector<2x128xf32>
    %cst_16 = arith.constant 0.000000e+00 : f32
    %19 = vector.broadcast %cst_16 : f32 to vector<2x128xf32>
    %20 = arith.mulf %3, %19 : vector<2x128xf32>
    %21 = arith.addf %18, %20 : vector<2x128xf32>
    %cst_17 = arith.constant -0.108236261 : f32
    %22 = vector.broadcast %cst_17 : f32 to vector<2x128xf32>
    %23 = arith.mulf %5, %22 : vector<2x128xf32>
    %24 = arith.addf %21, %23 : vector<2x128xf32>
    %c0_18 = arith.constant 0 : index
    %c1_19 = arith.constant 1 : index
    %c0_20 = arith.constant 0 : index
    %c0_21 = arith.constant 0 : index
    %25 = vector.load %arg3[%c0_18, %c1_19, %c0_20, %c0_21] : memref<1x3x2x128xf32, #tpu.memory_space<vmem>>, vector<1x1x2x128xf32>
    %26 = vector.shape_cast %25 : vector<1x1x2x128xf32> to vector<2x128xf32>
    %27 = vector.shape_cast %24 : vector<2x128xf32> to vector<1x1x2x128xf32>
    tpu.vector_store %arg3[%c0_18, %c1_19, %c0_20, %c0_21], %27 {strides = array<i32>} : memref<1x3x2x128xf32, #tpu.memory_space<vmem>>, vector<1x1x2x128xf32>,
    %cst_22 = arith.constant 0.584475815 : f32
    %28 = vector.broadcast %cst_22 : f32 to vector<2x128xf32>
    %29 = arith.mulf %1, %28 : vector<2x128xf32>
    %cst_23 = arith.constant -0.194825277 : f32
    %30 = vector.broadcast %cst_23 : f32 to vector<2x128xf32>
    %31 = arith.mulf %3, %30 : vector<2x128xf32>
    %32 = arith.addf %29, %31 : vector<2x128xf32>
    %cst_24 = arith.constant 0.0649417564 : f32
    %33 = vector.broadcast %cst_24 : f32 to vector<2x128xf32>
    %34 = arith.mulf %5, %33 : vector<2x128xf32>
    %35 = arith.addf %32, %34 : vector<2x128xf32>
    %c0_25 = arith.constant 0 : index
    %c2_26 = arith.constant 2 : index
    %c0_27 = arith.constant 0 : index
    %c0_28 = arith.constant 0 : index
    %36 = vector.load %arg3[%c0_25, %c2_26, %c0_27, %c0_28] : memref<1x3x2x128xf32, #tpu.memory_space<vmem>>, vector<1x1x2x128xf32>
    %37 = vector.shape_cast %36 : vector<1x1x2x128xf32> to vector<2x128xf32>
    %38 = vector.shape_cast %35 : vector<2x128xf32> to vector<1x1x2x128xf32>
    tpu.vector_store %arg3[%c0_25, %c2_26, %c0_27, %c0_28], %38 {strides = array<i32>} : memref<1x3x2x128xf32, #tpu.memory_space<vmem>>, vector<1x1x2x128xf32>,
    return
  }
  func.func @transform_0(%arg0: i32, %arg1: i32) -> (i32, i32, i32, i32) {
    %c0_i32 = arith.constant 0 : i32
    %c0_i32_0 = arith.constant 0 : i32
    %c0_i32_1 = arith.constant 0 : i32
    return %arg0, %c0_i32, %arg1, %c0_i32_0 : i32, i32, i32, i32
  }
  func.func @transform_1(%arg0: i32, %arg1: i32) -> (i32, i32, i32, i32) {
    %c0_i32 = arith.constant 0 : i32
    %c0_i32_0 = arith.constant 0 : i32
    %c0_i32_1 = arith.constant 0 : i32
    return %arg0, %c0_i32, %arg1, %c0_i32_0 : i32, i32, i32, i32
  }
}

</mosaic_0001>

<bundles_post_ra>
// kernel: tpu_custom_call.1
= control target key start
LH: loop header
LB: loop body
LE: loop exit
PB: predicated region body
PF: predicated region fallthrough
CT: control target
= control target key end

     0   :  { %6 = vsyncpa [#allocation3], 0  ;;  %s664_s0 = inlined_call_operand.hbm [shape: f32[2,3,2,128], index: 0, kind: input, shape index: {}]   ;;  %s665_s1 = inlined_call_operand.hbm [shape: f32[2,3,2,128], index: 1, kind: output, shape index: {}]  }
   0x1   :  { %8 = vsyncpa [#allocation3 + $0x1], 0 }
   0x2   :  { %9 = vsyncpa [#allocation4], 0 }
   0x3   :  { %11 = vsyncpa [#allocation4 + $0x1], 0  ;;  %s489_s6 = smov 0   ;;  %s491_s7 = smov 0  }
   0x4   :  { %s493_s8 = smov 0   ;;  %s495_s9 = smov 0  }
   0x5   :  { %s497_s10 = smov 0   ;;  %s499_s11 = smov 0  }
   0x6 LB: > { %s276_s12 = sadd.s32 4294967295, %s471_s11   ;;  %s277_s13 = sadd.s32 4294967294, %s471_s11   ;;  %s471_s11 = sphi %s499_s11, %s17_s11   ;;  %s467_s10 = sphi %s497_s10, %s680_s10   ;;  %s463_s9 = sphi %s495_s9, %s679_s9   ;;  %s459_s8 = sphi %s493_s8, %s678_s8   ;;  %s455_s7 = sphi %s491_s7, %s677_s7   ;;  %s451_s6 = sphi %s489_s6, %s676_s6  }
   0x7   : > { %s29_s14 = sadd.s32 1, %s467_s10  ;;  %s38_s15 = sadd.s32 1, %s459_s8 }
   0x8   : > { %p31_p0 = scmp.ge.s32.totalorder %s29_s14, 2  ;;  %p45_p1 = scmp.ne.s32.totalorder %s459_s8, %s455_s7 }
   0x9   : > { %p46_p2 = scmp.eq.s32.totalorder %s471_s11, 0  ;;  %p51_p3 = scmp.ne.s32.totalorder %s455_s7, %s451_s6 }
   0xa   : > { %s682_s14 = smov (%p31_p0, %s29_s14), 0  ;;  %p52_p5 = scmp.eq.s32.totalorder %s276_s12, 0 }
   0xb   : > { %p530_p4 = por %p46_p2, %p45_p1  ;;  %s33_s17 = ssub.s32 %s467_s10, %s682_s14 }
   0xc   : > { %p77_p6 = scmp.eq.s32.totalorder %s276_s12, 1  ;;  %p36_p7 = scmp.eq.s32.totalorder %s33_s17, 0 }
   0xd   : > { %p536_p8 = por %p52_p5, %p51_p3  ;;  %p83_p10 = scmp.eq.s32.totalorder %s277_s13, 1 }
   0xe   : > { %p540_p9 = por %p77_p6, %p45_p1  ;;  %p305_p13 = scmp.lt.s32.totalorder %s471_s11, 2 }
   0xf   : > { %s545_s20 = scalar_select %p36_p7, %s459_s8, %s38_s15  }
  0x10   : > { %s669_s19 = scalar_select %p540_p9, 1, 0 }
  0x11   : > { %p547_p11 = por %p83_p10, %p51_p3  ;;  %s103_s22 = sand.u32 1, %s459_s8  }
  0x12   : > { %s289_s23 = smul.u32 6, %s103_s22  ;;  %p557_p0 = pnand %p305_p13, %p530_p4 }
  0x13   : > { %s670_s21 = scalar_select %p547_p11, 1, 0 }
  0x14   : > { %s290_s24 = smul.u32 96, %s467_s10  ;;  %s107_s29 = scalar_lea.vmem [#allocation2], %s289_s23 }
  0x15   : > { %s115_s30 = sshll.u32 %s107_s29, 4  ;;  %s569_s2 = scalar_lea.sflag [#allocation3], %s103_s22  ;;  %s566_s30 = int_to_ptr.vmem [resolvable:$true] %s115_s30 }
  0x16   : > { %s564_s28 = scalar_lea.hbm %s664_s0, %s290_s24  ;;  %p361_p3 = pneg %p557_p0 }
  0x17   : > { %s359_s3 = scalar_lea.hbm %s564_s28, 96  ;;  %s364_s12 = scalar_lea.hbm %s664_s0, 192 }
  0x18   : > { %p360_p2 = scmp.ne.s32.totalorder %s564_s28, %s359_s3  ;;  %p365_p6 = scmp.lt.u32.totalorder %s564_s28, %s664_s0 }
  0x19   : > { %p366_p7 = scmp.lt.u32.totalorder %s364_s12, %s359_s3  ;;  %p368_p13 = scmp.lt.u32.totalorder %s359_s3, %s564_s28 }
  0x1a   : > { %p362_p4 = pnand %p361_p3, %p360_p2 }
  0x1b   : > { %p367_p10 = por %p366_p7, %p365_p6 }
  0x1c   : > { %p363_p5 = pneg %p362_p4 }
  0x1d   : > { %p369_p12 = por %p368_p13, %p367_p10 }
  0x1f   : > { %p370_p1 = pnand %p369_p12, %p363_p5 }
  0x21   : > { %373 = shalt.err (!%p370_p1)
}
  0x22   : > { %s374_s16 = scalar_lea.vmem %s566_s30, 96  ;;  %s473_s17 = smov [#allocation2]  }
  0x23   : > { %p375_p2 = scmp.ne.s32.totalorder %s566_s30, %s374_s16  ;;  %s379_s22 = sshll.u32 %s473_s17, 4  ;;  %s380_s22 = int_to_ptr.vmem [resolvable:$false] %s379_s22 }
  0x24   : > { %s381_s23 = scalar_lea.vmem %s380_s22, 192  ;;  %p382_p9 = scmp.lt.s32.totalorder %s566_s30, %s380_s22 }
  0x25   : > { %p377_p4 = pnand %p375_p2, %p361_p3  ;;  %p383_p6 = scmp.lt.s32.totalorder %s381_s23, %s374_s16 }
  0x27   : > { %p378_p11 = pneg %p377_p4  ;;  %p384_p7 = por %p383_p6, %p382_p9 }
  0x29   : > { %p385_p10 = pnand %p384_p7, %p378_p11 }
  0x2b   : > { %388 = shalt.err (!%p385_p10)
}
  0x2c   : > { %s474_s24 = smov 32   ;;  %s475_s26 = smov 2  }
  0x2d   : > { %300 = dma.hbm_to_vmem [thread:$0]  (!%p557_p0), %s564_s28, 96, %s566_s30, %s569_s2, %s474_s24, %s474_s24, %s475_s26  }
  0x2e   : > { %p123_p12 = scmp.lt.s32.totalorder %s471_s11, 3  ;;  %p672_p1 = scmp.ge.s32.totalorder %s471_s11, 1 }
  0x30   : > { %p124_p3 = pnand %p672_p1, %p123_p12 }
  0x31   : > { %s601_s27 = sand.u32 (!%p124_p3), 1, %s455_s7  }
  0x32   : > { %127 = sbr.rel (%p124_p3) target bundleno = 88 (0x58), region = 24  ;;  %s130_s3 = scalar_lea.sflag (!%p124_p3), [#allocation3], %s601_s27 }
  0x33   : > { %s291_s29 = smul.u32 (!%p124_p3), 6, %s601_s27 }
  0x35   : > { %s133_s4 = scalar_lea.vmem (!%p124_p3), [#allocation2], %s291_s29 }
  0x39   : > { %442 = dma.done.wait (%p536_p8), %s130_s3, 96  }
  0x3a   : > { %444 = vsyncadd (%p536_p8), %s130_s3, 4294967200  ;;  %v152_v0 = vld [vmem:[%s133_s4] sm:$0x3]  ;;  %v282_v1 = vld [vmem:[%s133_s4 + $0x2] sm:$0x3]  ;;  %s151_s25 = scalar_lea.vmem [#allocation5], %s291_s29 }
  0x3b   : > { %v283_v2 = vld [vmem:[%s133_s4 + $0x4] sm:$0x3]  ;;  %v157_v3 = vmul.f32 0.56282854, %v152_v0  ;;  %v158_v4 = vmul.f32 0.19482528, %v282_v1 }
  0x3c   : > { %v160_v5 = vmul.f32 0.043294504, %v283_v2  ;;  %v163_v6 = vmul.f32 0.5844758, %v152_v0  ;;  %v164_v7 = vmul.f32 0.0, %v282_v1  ;;  %s191_s28 = sshll.u32 %s151_s25, 4  ;;  %s610_s28 = int_to_ptr.vmem [resolvable:$true] %s191_s28 }
  0x3d   : > { %v166_v8 = vmul.f32 -0.10823626, %v283_v2  ;;  %v159_v9 = vadd.f32 %v158_v4, %v157_v3  ;;  %v170_v10 = vmul.f32 -0.19482528, %v282_v1  ;;  %v172_v11 = vmul.f32 0.06494176, %v283_v2 }
  0x3e   : > { %s292_s30 = smul.u32 96, %s463_s9  ;;  %v165_v12 = vadd.f32 %v164_v7, %v163_v6  ;;  %s177_s12 = scalar_lea.sflag [#allocation4], %s601_s27 }
  0x3f   : > { %v161_v13 = vadd.f32 %v160_v5, %v159_v9  ;;  %v171_v14 = vadd.f32 %v170_v10, %v163_v6  ;;  %s389_s9 = scalar_lea.vmem %s610_s28, 96  ;;  %p673_p9 = scmp.ne.s32.totalorder %s669_s19, 0 }
  0x40   : > { %v167_v15 = vadd.f32 %v166_v8, %v165_v12  ;;  %s615_s5 = scalar_lea.hbm %s665_s1, %s292_s30  ;;  %p390_p8 = scmp.ne.s32.totalorder %s610_s28, %s389_s9 }
  0x41   : > { %162 = vst [vmem:[%s151_s25] sm:$0x3] %v161_v13  ;;  %v173_v16 = vadd.f32 %v172_v11, %v171_v14  ;;  %s476_s13 = smov [#allocation5]  }
  0x42   : > { %284 = vst [vmem:[%s151_s25 + $0x2] sm:$0x3] %v167_v15  ;;  %p391_p11 = pnand %p390_p8, %p673_p9  ;;  %s393_s15 = sshll.u32 %s476_s13, 4  ;;  %s394_s15 = int_to_ptr.vmem [resolvable:$false] %s393_s15 }
  0x43   : > { %285 = vst [vmem:[%s151_s25 + $0x4] sm:$0x3] %v173_v16  ;;  %s395_s16 = scalar_lea.vmem %s394_s15, 192  ;;  %p396_p5 = scmp.lt.s32.totalorder %s610_s28, %s394_s15 }
  0x44   : > { %p392_p0 = pneg %p391_p11  ;;  %p397_p13 = scmp.lt.s32.totalorder %s395_s16, %s389_s9 }
  0x46   : > { %p398_p2 = por %p397_p13, %p396_p5 }
  0x48   : > { %p399_p4 = pnand %p398_p2, %p392_p0 }
  0x4a   : > { %402 = shalt.err (!%p399_p4)
}
  0x4b   : > { %s403_s17 = scalar_lea.hbm %s615_s5, 96  ;;  %s407_s24 = scalar_lea.hbm %s665_s1, 192 }
  0x4c   : > { %p404_p6 = scmp.ne.s32.totalorder %s615_s5, %s403_s17  ;;  %p408_p12 = scmp.lt.u32.totalorder %s615_s5, %s665_s1 }
  0x4d   : > { %p409_p1 = scmp.lt.u32.totalorder %s407_s24, %s403_s17  ;;  %p411_p8 = scmp.lt.u32.totalorder %s403_s17, %s615_s5 }
  0x4e   : > { %p405_p7 = pnand %p404_p6, %p673_p9 }
  0x4f   : > { %p410_p3 = por %p409_p1, %p408_p12 }
  0x50   : > { %p406_p10 = pneg %p405_p7 }
  0x51   : > { %p412_p11 = por %p411_p8, %p410_p3 }
  0x53   : > { %p413_p0 = pnand %p412_p11, %p406_p10 }
  0x55   : > { %416 = shalt.err (!%p413_p0)
}
  0x56   : > { %s477_s3 = smov 32   ;;  %s478_s4 = smov 2  }
  0x57   : > { %295 = dma.vmem_to_hbm [thread:$0]  (%p673_p9), %s610_s28, 96, %s615_s5, %s177_s12, %s477_s3, %s477_s3, %s478_s4  }
  0x58 PF: > { %s206_s25 = sand.u32 1, %s451_s6   ;;  %p674_p5 = scmp.ne.s32.totalorder %s670_s21, 0 }
  0x59   : > { %p675_p13 = scmp.ge.s32.totalorder %s471_s11, 2  ;;  %s207_s30 = scalar_lea.sflag [#allocation4], %s206_s25 }
  0x5b   : > { %p302_p2 = pnand %p675_p13, %p674_p5 }
  0x5d   : > { %446 = dma.done.wait (!%p302_p2), %s207_s30, 96  }
  0x5e   : > { %448 = vsyncadd (!%p302_p2), %s207_s30, 4294967200  ;;  %s17_s11 = sadd.s32 1, %s471_s11   ;;  %s676_s6 = smov %s455_s7 }
  0x5f   : > { %p14_p4 = scmp.ge.s32.totalorder %s17_s11, 4   ;;  %s677_s7 = smov %s459_s8 }
  0x60   : > { %s678_s8 = smov %s545_s20  ;;  %s679_s9 = smov %s467_s10 }
  0x61   : > { %s680_s10 = smov %s682_s14  ;;  %16 = sbr.rel (!%p14_p4) target bundleno = 6 (0x6), region = 73 }
  0x68   :  { %212 = vsyncpa [#allocation3], 1 }
  0x69   :  { %214 = vsyncpa [#allocation3 + $0x1], 1 }
  0x6a   :  { %215 = vsyncpa [#allocation4], 1 }
  0x6b   :  { %217 = vsyncpa [#allocation4 + $0x1], 1 }

</bundles_post_ra>
